<compile_context>
chip_gen: v6e
topology: v6e:2x2x1
jax: 0.10.0
libtpu: 0.0.40
codegen_flags: <defaults>
</compile_context>

<pallas_src>
import jax
import jax.numpy as jnp
from jax import lax
from jax.experimental import pallas as pl
from jax.experimental.pallas import tpu as pltpu


def _covariance_loss_kernel(pu_ref, qi_ref, qk_ref, o_ref):
    a = pu_ref[...].astype(jnp.float32)          # (Ra, D)
    b = qi_ref[...].astype(jnp.float32)          # (Rb, D)
    c = qk_ref[...].astype(jnp.float32)          # (Rc, D)

    r = a.shape[0] + b.shape[0] + c.shape[0]
    inv_r = jnp.float32(1.0 / r)

    # Column mean over the (virtually) concatenated rows.
    mean = (jnp.sum(a, axis=0, keepdims=True)
            + jnp.sum(b, axis=0, keepdims=True)
            + jnp.sum(c, axis=0, keepdims=True)) * inv_r     # (1, D)

    ac = a - mean
    bc = b - mean
    cc = c - mean

    def gram(x):
        # X^T X, contracting the row (sublane) axis on the MXU, f32 accumulate.
        return lax.dot_general(
            x, x,
            dimension_numbers=(((0,), (0,)), ((), ())),
            preferred_element_type=jnp.float32)

    cov = (gram(ac) + gram(bc) + gram(cc)) * inv_r           # (D, D)

    # diag(C) directly from the centered columns -- no iota / select mask.
    diag = (jnp.sum(ac * ac, axis=0)
            + jnp.sum(bc * bc, axis=0)
            + jnp.sum(cc * cc, axis=0)) * inv_r              # (D,)

    # loss = ||C||_F^2 - ||diag(C)||^2  == sum of squared off-diagonals.
    o_ref[0, 0] = jnp.sum(cov * cov) - jnp.sum(diag * diag)


def covariance_loss(p_u, q_i, q_k):
    # Metadata-only reshape; no HBM concat -- the three pieces go straight in.
    q_k_flat = q_k.reshape(q_k.shape[0] * q_k.shape[1], -1)
    Ra, D = p_u.shape
    Rb, _ = q_i.shape
    Rc, _ = q_k_flat.shape
    R = Ra + Rb + Rc

    itemsize = jnp.dtype(p_u.dtype).itemsize
    cost = pl.CostEstimate(
        flops=2 * R * D * D,
        transcendentals=0,
        bytes_accessed=R * D * itemsize + 4,
    )

    out = pl.pallas_call(
        _covariance_loss_kernel,
        out_shape=jax.ShapeDtypeStruct((1, 1), jnp.float32),
        in_specs=[
            pl.BlockSpec((Ra, D), lambda: (0, 0)),
            pl.BlockSpec((Rb, D), lambda: (0, 0)),
            pl.BlockSpec((Rc, D), lambda: (0, 0)),
        ],
        # Scalar reduction result belongs in SMEM (no masked VMEM vst / DMA).
        out_specs=pl.BlockSpec(memory_space=pltpu.MemorySpace.SMEM),
        cost_estimate=cost,
    )(p_u, q_i, q_k_flat)
    return out[0, 0]


def _reference(p_u, q_i, q_k):
    # Pure-JAX reference mirroring the PyTorch module.
    q_k_flat = q_k.reshape(q_k.shape[0] * q_k.shape[1], -1)
    x = jnp.concatenate([p_u, q_i, q_k_flat], axis=0).astype(jnp.float32)
    num_row = x.shape[0]
    xc = x - jnp.mean(x, axis=0)
    cov = xc.T @ xc / num_row
    return jnp.sum(cov ** 2) - jnp.sum(jnp.diag(cov) ** 2)


if __name__ == "__main__":
    key = jax.random.PRNGKey(0)
    k1, k2, k3 = jax.random.split(key, 3)

    D = 32
    p_u = jax.random.normal(k1, (8, D), dtype=jnp.float32)     # user embeddings
    q_i = jax.random.normal(k2, (8, D), dtype=jnp.float32)     # pos item embeddings
    q_k = jax.random.normal(k3, (2, 4, D), dtype=jnp.float32)  # neg items -> 8 rows

    loss = covariance_loss(p_u, q_i, q_k)
    jax.block_until_ready(loss)

    ref = _reference(p_u, q_i, q_k)
    assert jnp.allclose(loss, ref, rtol=1e-5, atol=1e-5), (loss, ref)

    print("KERNEL_OK")
</pallas_src>

<mosaic_0001>
module attributes {stable_mosaic.version = 11 : i64} {
  func.func @_covariance_loss_kernel(%arg0: memref<8x32xf32, #tpu.memory_space<vmem>>, %arg1: memref<8x32xf32, #tpu.memory_space<vmem>>, %arg2: memref<8x32xf32, #tpu.memory_space<vmem>>, %arg3: memref<1x1xf32, #tpu.memory_space<smem>>) attributes {dimension_semantics = [], scalar_prefetch = 0 : i64, scratch_operands = 0 : i64, tpu.core_type = #tpu.core_type<tc>} {
    %c0 = arith.constant 0 : index
    %c0_0 = arith.constant 0 : index
    %0 = vector.load %arg0[%c0, %c0_0] : memref<8x32xf32, #tpu.memory_space<vmem>>, vector<8x32xf32>
    %c0_1 = arith.constant 0 : index
    %c0_2 = arith.constant 0 : index
    %1 = vector.load %arg1[%c0_1, %c0_2] : memref<8x32xf32, #tpu.memory_space<vmem>>, vector<8x32xf32>
    %c0_3 = arith.constant 0 : index
    %c0_4 = arith.constant 0 : index
    %2 = vector.load %arg2[%c0_3, %c0_4] : memref<8x32xf32, #tpu.memory_space<vmem>>, vector<8x32xf32>
    %cst = arith.constant dense<0.000000e+00> : vector<32xf32>
    %3 = vector.multi_reduction <add>, %0, %cst [0] : vector<8x32xf32> to vector<32xf32>
    %4 = vector.shape_cast %3 : vector<32xf32> to vector<1x32xf32>
    %cst_5 = arith.constant dense<0.000000e+00> : vector<32xf32>
    %5 = vector.multi_reduction <add>, %1, %cst_5 [0] : vector<8x32xf32> to vector<32xf32>
    %6 = vector.shape_cast %5 : vector<32xf32> to vector<1x32xf32>
    %7 = arith.addf %4, %6 : vector<1x32xf32>
    %cst_6 = arith.constant dense<0.000000e+00> : vector<32xf32>
    %8 = vector.multi_reduction <add>, %2, %cst_6 [0] : vector<8x32xf32> to vector<32xf32>
    %9 = vector.shape_cast %8 : vector<32xf32> to vector<1x32xf32>
    %10 = arith.addf %7, %9 : vector<1x32xf32>
    %cst_7 = arith.constant 0.0416666679 : f32
    %11 = vector.broadcast %cst_7 : f32 to vector<1x32xf32>
    %12 = arith.mulf %10, %11 : vector<1x32xf32>
    %13 = vector.broadcast %12 : vector<1x32xf32> to vector<8x32xf32>
    %14 = arith.subf %0, %13 : vector<8x32xf32>
    %15 = vector.broadcast %12 : vector<1x32xf32> to vector<8x32xf32>
    %16 = arith.subf %1, %15 : vector<8x32xf32>
    %17 = vector.broadcast %12 : vector<1x32xf32> to vector<8x32xf32>
    %18 = arith.subf %2, %17 : vector<8x32xf32>
    %cst_8 = arith.constant dense<0.000000e+00> : vector<32x32xf32>
    %19 = tpu.matmul %14, %14, %cst_8 {dimension_numbers = #tpu.dot_dimension_numbers<[0], [0], [1], [1], [0, 1, 1, 1], [], []>} : vector<8x32xf32>, vector<8x32xf32>, vector<32x32xf32> -> vector<32x32xf32>
    %cst_9 = arith.constant dense<0.000000e+00> : vector<32x32xf32>
    %20 = tpu.matmul %16, %16, %cst_9 {dimension_numbers = #tpu.dot_dimension_numbers<[0], [0], [1], [1], [0, 1, 1, 1], [], []>} : vector<8x32xf32>, vector<8x32xf32>, vector<32x32xf32> -> vector<32x32xf32>
    %21 = arith.addf %19, %20 : vector<32x32xf32>
    %cst_10 = arith.constant dense<0.000000e+00> : vector<32x32xf32>
    %22 = tpu.matmul %18, %18, %cst_10 {dimension_numbers = #tpu.dot_dimension_numbers<[0], [0], [1], [1], [0, 1, 1, 1], [], []>} : vector<8x32xf32>, vector<8x32xf32>, vector<32x32xf32> -> vector<32x32xf32>
    %23 = arith.addf %21, %22 : vector<32x32xf32>
    %cst_11 = arith.constant 0.0416666679 : f32
    %24 = vector.broadcast %cst_11 : f32 to vector<32x32xf32>
    %25 = arith.mulf %23, %24 : vector<32x32xf32>
    %26 = arith.mulf %14, %14 : vector<8x32xf32>
    %cst_12 = arith.constant dense<0.000000e+00> : vector<32xf32>
    %27 = vector.multi_reduction <add>, %26, %cst_12 [0] : vector<8x32xf32> to vector<32xf32>
    %28 = arith.mulf %16, %16 : vector<8x32xf32>
    %cst_13 = arith.constant dense<0.000000e+00> : vector<32xf32>
    %29 = vector.multi_reduction <add>, %28, %cst_13 [0] : vector<8x32xf32> to vector<32xf32>
    %30 = arith.addf %27, %29 : vector<32xf32>
    %31 = arith.mulf %18, %18 : vector<8x32xf32>
    %cst_14 = arith.constant dense<0.000000e+00> : vector<32xf32>
    %32 = vector.multi_reduction <add>, %31, %cst_14 [0] : vector<8x32xf32> to vector<32xf32>
    %33 = arith.addf %30, %32 : vector<32xf32>
    %cst_15 = arith.constant 0.0416666679 : f32
    %34 = vector.broadcast %cst_15 : f32 to vector<32xf32>
    %35 = arith.mulf %33, %34 : vector<32xf32>
    %36 = arith.mulf %25, %25 : vector<32x32xf32>
    %37 = vector.shape_cast %36 : vector<32x32xf32> to vector<1x32x32xf32>
    %cst_16 = arith.constant dense<0.000000e+00> : vector<1xf32>
    %38 = vector.multi_reduction <add>, %37, %cst_16 [1, 2] : vector<1x32x32xf32> to vector<1xf32>
    %39 = vector.shape_cast %38 : vector<1xf32> to vector<1x1x1xf32>
    %40 = vector.extract %39[0, 0, 0] : f32 from vector<1x1x1xf32>
    %41 = arith.mulf %35, %35 : vector<32xf32>
    %42 = vector.shape_cast %41 : vector<32xf32> to vector<1x32xf32>
    %cst_17 = arith.constant dense<0.000000e+00> : vector<1xf32>
    %43 = vector.multi_reduction <add>, %42, %cst_17 [1] : vector<1x32xf32> to vector<1xf32>
    %44 = vector.shape_cast %43 : vector<1xf32> to vector<1x1xf32>
    %45 = vector.extract %44[0, 0] : f32 from vector<1x1xf32>
    %46 = arith.subf %40, %45 : f32
    %c0_18 = arith.constant 0 : index
    %c0_19 = arith.constant 0 : index
    %47 = memref.load %arg3[%c0_18, %c0_19] : memref<1x1xf32, #tpu.memory_space<smem>>
    memref.store %46, %arg3[%c0_18, %c0_19] : memref<1x1xf32, #tpu.memory_space<smem>>
    return
  }
}

</mosaic_0001>

<bundles_post_ra>
// kernel: tpu_custom_call.1
= control target key start
LH: loop header
LB: loop body
LE: loop exit
PB: predicated region body
PF: predicated region fallthrough
CT: control target
= control target key end

     0   :  { %8 = vsyncpa [#allocation3], 0  ;;  %s742_s0 = inlined_call_operand.hbm [shape: f32[8,32], index: 0, kind: input, shape index: {}]   ;;  %s743_s1 = inlined_call_operand.hbm [shape: f32[8,32], index: 1, kind: input, shape index: {}]   ;;  %s744_s2 = inlined_call_operand.hbm [shape: f32[8,32], index: 2, kind: input, shape index: {}]   ;;  %s745_s3 = inlined_call_operand.hbm [shape: f32[1,1], index: 3, kind: output, shape index: {}]  }
   0x1   :  { %9 = vsyncpa [#allocation6], 0 }
   0x2   :  { %10 = vsyncpa [#allocation4], 0  ;;  %s683_s12 = smov [#allocation5]   ;;  %s684_s14 = smov [#allocation2]  }
   0x3   :  { %s27_s13 = sshll.u32 %s683_s12, 4  ;;  %s17_s15 = sshll.u32 %s684_s14, 4  ;;  %s28_s13 = int_to_ptr.vmem [resolvable:$true] %s27_s13  ;;  %s18_s15 = int_to_ptr.vmem [resolvable:$true] %s17_s15 }
   0x4   :  { %s617_s16 = scalar_lea.vmem %s28_s13, 128  ;;  %p622_p1 = scmp.lt.s32.totalorder %s28_s13, %s28_s13 }
   0x5   :  { %p618_p0 = scmp.ne.s32.totalorder %s28_s13, %s617_s16  ;;  %p623_p2 = scmp.lt.s32.totalorder %s617_s16, %s617_s16 }
   0x7   :  { %p624_p3 = por %p623_p2, %p622_p1 }
   0x9   :  { %p625_p4 = pnand %p624_p3, %p618_p0 }
   0xb   :  { %628 = shalt.err (!%p625_p4)
}
   0xc   :  { %30 = dma.hbm_to_vmem [thread:$0]  %s743_s1, 128, %s28_s13, [#allocation6]  }
   0xd   :  { %s637_s19 = scalar_lea.vmem %s18_s15, 128  ;;  %p642_p6 = scmp.lt.s32.totalorder %s18_s15, %s18_s15 }
   0xe   :  { %p638_p5 = scmp.ne.s32.totalorder %s18_s15, %s637_s19  ;;  %p643_p7 = scmp.lt.s32.totalorder %s637_s19, %s637_s19 }
  0x10   :  { %p644_p8 = por %p643_p7, %p642_p6 }
  0x12   :  { %p645_p9 = pnand %p644_p8, %p638_p5 }
  0x14   :  { %648 = shalt.err (!%p645_p9)
}
  0x15   :  { %20 = dma.hbm_to_vmem [thread:$0]  %s742_s0, 128, %s18_s15, [#allocation3]  }
  0x16   :  { %s685_s22 = smov [#allocation7]  }
  0x17   :  { %s37_s23 = sshll.u32 %s685_s22, 4  ;;  %s38_s23 = int_to_ptr.vmem [resolvable:$true] %s37_s23 }
  0x18   :  { %s657_s24 = scalar_lea.vmem %s38_s23, 128  ;;  %p662_p11 = scmp.lt.s32.totalorder %s38_s23, %s38_s23 }
  0x19   :  { %p658_p10 = scmp.ne.s32.totalorder %s38_s23, %s657_s24  ;;  %p663_p12 = scmp.lt.s32.totalorder %s657_s24, %s657_s24 }
  0x1b   :  { %p664_p13 = por %p663_p12, %p662_p11 }
  0x1d   :  { %p665_p0 = pnand %p664_p13, %p658_p10 }
  0x1f   :  { %668 = shalt.err (!%p665_p0)
}
  0x20   :  { %40 = dma.hbm_to_vmem [thread:$0]  %s744_s2, 128, %s38_s23, [#allocation6]  }
  0x21   :  { %677 = dma.done.wait [#allocation3], 128  }
  0x22   :  { %678 = vsyncadd [#allocation3], 4294967168 }
  0x23   :  { %679 = dma.done.wait [#allocation6], 256  }
  0x24   :  { %680 = vsyncadd [#allocation6], 4294967040  ;;  %vm53_vm0 = vcmask 261120   ;;  %v50_v0 = vld [vmem:[#allocation2] sm:$0xff]  ;;  %v51_v1 = vld [vmem:[#allocation5] sm:$0xff]  ;;  %vm113_vm1 = vcmask 64512  }
  0x25   :  { %v52_v2 = vld [vmem:[#allocation7] sm:$0xff]  ;;  %v54_v3 = vsel %vm53_vm0, %v50_v0, 0.0  ;;  %v61_v4 = vsel %vm53_vm0, %v51_v1, 0.0  ;;  %s686_s27 = smov [#allocation8]  }
  0x26   :  { %v69_v5 = vsel %vm53_vm0, %v52_v2, 0.0  ;;  %v55_v6 = vrot.slane %v54_v3, 4  ;;  %v62_v7 = vrot.slane %v61_v4, 4 }
  0x27   :  { %v70_v8 = vrot.slane %v69_v5, 4 }
  0x28   :  { %v56_v9 = vadd.f32 %v55_v6, %v54_v3  ;;  %v63_v10 = vadd.f32 %v62_v7, %v61_v4 }
  0x29   :  { %v71_v11 = vadd.f32 %v70_v8, %v69_v5 }
  0x2a   :  { %v57_v12 = vrot.slane %v56_v9, 2  ;;  %v64_v13 = vrot.slane %v63_v10, 2 }
  0x2b   :  { %v72_v14 = vrot.slane %v71_v11, 2 }
  0x2c   :  { %v58_v15 = vadd.f32 %v57_v12, %v56_v9  ;;  %v65_v16 = vadd.f32 %v64_v13, %v63_v10 }
  0x2d   :  { %v73_v17 = vadd.f32 %v72_v14, %v71_v11 }
  0x2e   :  { %v59_v18 = vrot.slane %v58_v15, 1  ;;  %v66_v19 = vrot.slane %v65_v16, 1 }
  0x2f   :  { %v74_v20 = vrot.slane %v73_v17, 1 }
  0x30   :  { %v60_v21 = vadd.f32 %v59_v18, %v58_v15  ;;  %v67_v22 = vadd.f32 %v66_v19, %v65_v16 }
  0x31   :  { %v75_v23 = vadd.f32 %v74_v20, %v73_v17 }
  0x32   :  { %v68_v24 = vadd.f32 %v67_v22, %v60_v21 }
  0x34   :  { %v76_v25 = vadd.f32 %v75_v23, %v68_v24 }
  0x36   :  { %v77_v26 = vmul.f32 0.041666668, %v76_v25 }
  0x38   :  { %v79_v27 = vsub.f32 %v51_v1, %v77_v26  ;;  %v80_v28 = vsub.f32 %v52_v2, %v77_v26  ;;  %v78_v29 = vsub.f32 %v50_v0, %v77_v26 }
  0x3a   :  { %81 = vxpose.xlu0.b32.start.end [1/1] (short) (narrow) %v79_v27, 32  ;;  %340 = vxpose.xlu1.b32.start.end [1/1] (short) (narrow) %v80_v28, 32  ;;  %v477_v42 = vmul.f32 %v78_v29, %v78_v29  ;;  %v485_v43 = vmul.f32 %v79_v27, %v79_v27  ;;  %v494_v46 = vmul.f32 %v80_v28, %v80_v28 }
  0x3b   :  { %574 = vmatprep.subr.mxu0 %v79_v27  ;;  %598 = vmatprep.subr.mxu1 %v79_v27 }
  0x3c   :  { %575 = vmatpush3.msra.mxu0 %v79_v27  ;;  %599 = vmatpush3.msra.mxu1 %v79_v27  ;;  %v478_v44 = vsel %vm53_vm0, %v477_v42, 0.0  ;;  %v486_v45 = vsel %vm53_vm0, %v485_v43, 0.0  ;;  %v495_v49 = vsel %vm53_vm0, %v494_v46, 0.0 }
  0x3d   :  { %582 = vmatprep.subr.mxu1 %v78_v29  ;;  %590 = vmatprep.subr.mxu0 %v80_v28  ;;  %v479_v47 = vrot.slane %v478_v44, 4  ;;  %v487_v48 = vrot.slane %v486_v45, 4  ;;  %v496_v52 = vrot.slane %v495_v49, 4 }
  0x3f   :  { %v480_v50 = vadd.f32 %v479_v47, %v478_v44  ;;  %v488_v51 = vadd.f32 %v487_v48, %v486_v45  ;;  %v497_v55 = vadd.f32 %v496_v52, %v495_v49 }
  0x41   :  { %v481_v53 = vrot.slane %v480_v50, 2  ;;  %v489_v54 = vrot.slane %v488_v51, 2  ;;  %v498_v58 = vrot.slane %v497_v55, 2 }
  0x43   :  { %v482_v56 = vadd.f32 %v481_v53, %v480_v50  ;;  %v490_v57 = vadd.f32 %v489_v54, %v488_v51  ;;  %v499_v61 = vadd.f32 %v498_v58, %v497_v55 }
  0x45   :  { %v483_v59 = vrot.slane %v482_v56, 1  ;;  %v491_v60 = vrot.slane %v490_v57, 1  ;;  %v500_v0 = vrot.slane %v499_v61, 1 }
  0x47   :  { %211 = vxpose.xlu0.b32.start.end [1/1] (short) (narrow) %v78_v29, 32  ;;  %v484_v62 = vadd.f32 %v483_v59, %v482_v56  ;;  %v492_v63 = vadd.f32 %v491_v60, %v490_v57  ;;  %v501_v2 = vadd.f32 %v500_v0, %v499_v61 }
  0x49   :  { %v493_v1 = vadd.f32 %v492_v63, %v484_v62 }
  0x4b   :  { %v502_v3 = vadd.f32 %v501_v2, %v493_v1 }
  0x4d   :  { %v503_v4 = vmul.f32 0.041666668, %v502_v3 }
  0x4f   :  { %v524_v5 = vmul.f32 %v503_v4, %v503_v4 }
  0x51   :  { %v525_v6 = vsel %vm53_vm0, %v524_v5, 0.0 }
  0x80   :  { %526 = vadd.xlane.f32.xlu0 %v525_v6 }
  0xb6   :  { %v97_v30 = vpop.trf.xlu0  ;;  %v356_v31 = vpop.trf.xlu1 }
  0xb7   :  { %576 = vmatprep.mubr.msk.f32.mxu0 %vm113_vm1, %v97_v30 }
  0xba   :  { %v98_v32 = vpop.trf.xlu0  ;;  %v357_v33 = vpop.trf.xlu1 }
  0xbb   :  { %577 = vmatmul.mubr.msk.f32.vlgmr.msra.gmra.mxu0 %vm113_vm1, %v98_v32 }
  0xbc   :  { %592 = vmatprep.mubr.msk.f32.mxu0 %vm113_vm1, %v356_v31  ;;  %591 = vmatpush3.msra.mxu0 %v80_v28 }
  0xbe   :  { %v99_v34 = vpop.trf.xlu0  ;;  %v358_v35 = vpop.trf.xlu1 }
  0xbf   :  { %579 = vmatprep.mubr.msk.f32.mxu1 %vm113_vm1, %v99_v34  ;;  %593 = vmatmul.mubr.msk.f32.vlgmr.msra.gmra.mxu0 %vm113_vm1, %v357_v33 }
  0xc0   :  { %595 = vmatprep.mubr.msk.f32.mxu0 %vm113_vm1, %v358_v35 }
  0xc2   :  { %v100_v36 = vpop.trf.xlu0  ;;  %v359_v37 = vpop.trf.xlu1 }
  0xc3   :  { %580 = vmatmul.mubr.msk.f32.vlgmr.msra.gmra.mxu1 %vm113_vm1, %v100_v36  ;;  %596 = vmatmul.mubr.msk.f32.gmra.mxu0 %vm113_vm1, %v359_v37 }
  0xc4   :  { %583 = vmatpush3.msra.mxu1 %v78_v29 }
  0xc6   :  { %v227_v38 = vpop.trf.xlu0 }
  0xc7   :  { %584 = vmatprep.mubr.msk.f32.mxu1 %vm113_vm1, %v227_v38 }
  0xca   :  { %v228_v39 = vpop.trf.xlu0 }
  0xcb   :  { %585 = vmatmul.mubr.msk.f32.vlgmr.msra.gmra.mxu1 %vm113_vm1, %v228_v39 }
  0xce   :  { %v229_v40 = vpop.trf.xlu0 }
  0xcf   :  { %587 = vmatprep.mubr.msk.f32.mxu1 %vm113_vm1, %v229_v40 }
  0xd2   :  { %v230_v41 = vpop.trf.xlu0 }
  0xd3   :  { %588 = vmatmul.mubr.msk.f32.gmra.mxu1 %vm113_vm1, %v230_v41 }
 0x109   :  { %v527_v48 = vpop.xlane.xlu0 %526 }
 0x17b   :  { %v578_v7 = vpop.f32.mrf.mxu0 }
 0x17d   :  { %v192_v9 = vpop.f32.mrf.mxu0 }
 0x17f   :  { %v594_v12 = vpop.f32.mrf.mxu0 }
 0x181   :  { %v450_v16 = vpop.f32.mrf.mxu0 }
 0x183   :  { %v581_v8 = vpop.f32.mrf.mxu1  ;;  %v597_v21 = vpop.f32.mrf.mxu0 }
 0x185   :  { %v202_v10 = vpop.f32.mrf.mxu1  ;;  %v460_v28 = vpop.f32.mrf.mxu0 }
 0x18b   :  { %v586_v11 = vpop.f32.mrf.mxu1 }
 0x18c   :  { %v327_v13 = vadd.f32 %v586_v11, %v578_v7 }
 0x18d   :  { %v321_v14 = vpop.f32.mrf.mxu1 }
 0x18e   :  { %v322_v15 = vadd.f32 %v321_v14, %v192_v9  ;;  %v470_v17 = vadd.f32 %v594_v12, %v327_v13 }
 0x190   :  { %v469_v18 = vadd.f32 %v450_v16, %v322_v15  ;;  %v474_v22 = vmul.f32 0.041666668, %v470_v17 }
 0x192   :  { %v473_v19 = vmul.f32 0.041666668, %v469_v18  ;;  %v505_v29 = vmul.f32 %v474_v22, %v474_v22 }
 0x193   :  { %v589_v20 = vpop.f32.mrf.mxu1 }
 0x194   :  { %v337_v23 = vadd.f32 %v589_v20, %v581_v8  ;;  %v504_v25 = vmul.f32 %v473_v19, %v473_v19  ;;  %v509_v34 = vsel %vm53_vm0, %v505_v29, 0.0 }
 0x195   :  { %v331_v24 = vpop.f32.mrf.mxu1 }
 0x196   :  { %v472_v26 = vadd.f32 %v597_v21, %v337_v23  ;;  %v332_v27 = vadd.f32 %v331_v24, %v202_v10  ;;  %v508_v32 = vsel %vm53_vm0, %v504_v25, 0.0 }
 0x197   :  { %v510_v37 = vadd.f32 %v509_v34, %v508_v32 }
 0x198   :  { %v476_v30 = vmul.f32 0.041666668, %v472_v26  ;;  %v471_v31 = vadd.f32 %v460_v28, %v332_v27 }
 0x19a   :  { %v475_v33 = vmul.f32 0.041666668, %v471_v31  ;;  %v507_v35 = vmul.f32 %v476_v30, %v476_v30 }
 0x19c   :  { %v506_v36 = vmul.f32 %v475_v33, %v475_v33  ;;  %v513_v40 = vsel %vm53_vm0, %v507_v35, 0.0 }
 0x19e   :  { %v511_v38 = vsel %vm53_vm0, %v506_v36, 0.0 }
 0x19f   :  { %v512_v39 = vadd.f32 %v511_v38, %v510_v37 }
 0x1a1   :  { %v514_v41 = vadd.f32 %v513_v40, %v512_v39 }
 0x1a3   :  { %515 = vadd.xlane.f32.xlu1 %v514_v41 }
 0x22c   :  { %v516_v42 = vpop.xlane.xlu1 %515 }
 0x22d   :  { %v517_v43 = vrot.slane %v516_v42, 4 }
 0x22f   :  { %v518_v44 = vadd.f32 %v517_v43, %v516_v42 }
 0x231   :  { %v519_v45 = vrot.slane %v518_v44, 2 }
 0x233   :  { %v520_v46 = vadd.f32 %v519_v45, %v518_v44 }
 0x235   :  { %v521_v47 = vrot.slane %v520_v46, 1 }
 0x237   :  { %v522_v49 = vadd.f32 %v521_v47, %v520_v46 }
 0x239   :  { %600 = vpush %v522_v49 }
 0x23a   :  { %602 = vpush %v527_v48 }
 0x26a   :  { %s601_s0 = spop %600 }
 0x26b   :  { %s603_s2 = spop %602 }
 0x26c   :  { %s529_s26 = ssub.f32 %s601_s0, %s603_s2 }
 0x26e   :  { %531 = sst [smem:[#allocation8]] %s529_s26 }
 0x26f   :  { %539 = dma.smem_to_hbm %s686_s27, 16, %s745_s3, [#allocation4]  }
 0x270   :  { %681 = dma.done.wait [#allocation4], 16  }
 0x271   :  { %682 = vsyncadd [#allocation4], 4294967280 }
 0x272   :  { %543 = sfence }
 0x273   :  { %544 = vsyncpa [#allocation3], 1 }
 0x274   :  { %545 = vsyncpa [#allocation6], 1 }
 0x275   :  { %546 = vsyncpa [#allocation4], 1 }

</bundles_post_ra>
